<compile_context>
chip_gen: v7x
topology: tpu7x:2x2x1
jax: 0.10.0
libtpu: 0.0.40
codegen_flags: <defaults>
</compile_context>

<pallas_src>
import functools

import jax
import jax.numpy as jnp
from jax.experimental import pallas as pl
from jax.experimental.pallas import tpu as pltpu


# ----------------------------------------------------------------------------
# Pallas kernel: fused MLPModel forward  y = relu(x @ W1 + b1) @ W2 + b2
# One grid step per (tag, layer); each step streams that MLP's bf16 weights.
# ----------------------------------------------------------------------------
def _mlp_kernel(x_ref, w1_ref, b1_ref, w2_ref, b2_ref, o_ref):
    # x_ref : (M, E)  bf16      w1_ref: (E, H) bf16     b1_ref: (1, H) f32
    # w2_ref: (H, H) bf16       b2_ref: (1, H) f32      o_ref : (M, H) f32
    h = jnp.dot(x_ref[...], w1_ref[...], preferred_element_type=jnp.float32)
    h = jnp.maximum(h + b1_ref[...], 0.0)                       # bias + ReLU
    y = jnp.dot(h.astype(jnp.bfloat16), w2_ref[...],
                preferred_element_type=jnp.float32)
    o_ref[...] = y + b2_ref[...]


def fused_mlp_stack_forward(x, w1, b1, w2, b2):
    """Apply T*L independent MLPs (T tags, L layers each) in one pallas_call.

    x  : (T, M, E)     bf16  per-tag input rows (padded to M, shared across L)
    w1 : (T, L, E, H)  bf16  fc1 weight, pre-transposed to (in, out)
    b1 : (T, L, 1, H)  f32
    w2 : (T, L, H, H)  bf16  fc2 weight, pre-transposed
    b2 : (T, L, 1, H)  f32
    returns (T, L, M, H) float32
    """
    T, L, E, H = w1.shape
    M = x.shape[1]
    return pl.pallas_call(
        _mlp_kernel,
        out_shape=jax.ShapeDtypeStruct((T, L, M, H), jnp.float32),
        grid_spec=pltpu.PrefetchScalarGridSpec(
            num_scalar_prefetch=0,
            grid=(T, L),
            in_specs=[
                # leading size-1 dims squeezed -> kernel sees 2-D refs
                pl.BlockSpec((None, M, E), lambda t, l: (t, 0, 0)),        # x[t]
                pl.BlockSpec((None, None, E, H), lambda t, l: (t, l, 0, 0)),  # w1
                pl.BlockSpec((None, None, 1, H), lambda t, l: (t, l, 0, 0)),  # b1
                pl.BlockSpec((None, None, H, H), lambda t, l: (t, l, 0, 0)),  # w2
                pl.BlockSpec((None, None, 1, H), lambda t, l: (t, l, 0, 0)),  # b2
            ],
            out_specs=pl.BlockSpec((None, None, M, H),
                                   lambda t, l: (t, l, 0, 0)),
        ),
        compiler_params=pltpu.CompilerParams(
            dimension_semantics=("parallel", "parallel")),
    )(x, w1, b1, w2, b2)


# ----------------------------------------------------------------------------
# Parameter construction (deterministic, synthetic -- no checkpoint load).
# Tag order along the leading axis: [domain, sentiment, genre, keywords].
# ----------------------------------------------------------------------------
def init_params(key, *, vocab, n_layer, n_embd, n_tags=4):
    H = 2 * n_embd
    k0, k1, k2, k3, k4 = jax.random.split(key, 5)
    wte = jax.random.normal(k0, (vocab, n_embd), jnp.float32) * 0.02
    # nn.Linear stores (out, in); we pre-transpose to (in, out) and store the
    # big weight matrices in bf16 (halves HBM streaming bytes).
    w1 = (jax.random.normal(k1, (n_tags, n_layer, n_embd, H), jnp.float32)
          * 0.02).astype(jnp.bfloat16)
    b1 = jax.random.normal(k2, (n_tags, n_layer, 1, H), jnp.float32) * 0.02
    w2 = (jax.random.normal(k3, (n_tags, n_layer, H, H), jnp.float32)
          * 0.02).astype(jnp.bfloat16)
    b2 = jax.random.normal(k4, (n_tags, n_layer, 1, H), jnp.float32) * 0.02
    return {"wte": wte, "w1": w1, "b1": b1, "w2": w2, "b2": b2}


def _round_up(x, m):
    return -(-x // m) * m


# ----------------------------------------------------------------------------
# SSTModel.forward equivalent (up to the lm_model call).
# ----------------------------------------------------------------------------
@functools.partial(jax.jit, static_argnames=("n_layer", "n_head", "n_embd",
                                             "use_label_only"))
def sst_forward(params, input_ids, domain_id, keywords_id, sentiment_id,
                genre_id, domain_mask, keyword_mask, sentiment_mask,
                genre_mask, mask, *, n_layer, n_head, n_embd,
                use_label_only=False):
    E = n_embd
    H = 2 * n_embd
    esph = n_embd // n_head
    L = n_layer
    B = input_ids.shape[0]
    wte = params["wte"]

    # wte(tag_id.unsqueeze(1)) -> (B, 1, E); we keep the equivalent (B, E)
    # rows (row-major flatten is identical, which is all the reshape uses).
    dom_emb = jnp.take(wte, domain_id, axis=0)            # (B, E)
    sen_emb = jnp.take(wte, sentiment_id, axis=0)         # (B, E)
    gen_emb = jnp.take(wte, genre_id, axis=0)             # (B, E)
    kw_emb = jnp.take(wte, keywords_id, axis=0)           # (B, K, E)
    K = kw_emb.shape[1]
    kw_flat = kw_emb.reshape(B * K, E)

    # Pad rows up to a sublane multiple of 8; one common M for all tags so a
    # single stacked input feeds the fused kernel.  Padded rows are discarded.
    M_pad = max(8, _round_up(max(B, B * K), 8))

    def pad_rows(a):
        return jnp.pad(a, ((0, M_pad - a.shape[0]), (0, 0)))

    x_stacked = jnp.stack(
        [pad_rows(dom_emb), pad_rows(sen_emb), pad_rows(gen_emb),
         pad_rows(kw_flat)], axis=0).astype(jnp.bfloat16)  # (4, M_pad, E)

    out = fused_mlp_stack_forward(
        x_stacked, params["w1"], params["b1"], params["w2"], params["b2"])
    # out: (4, L, M_pad, H) float32

    def to_past(tag_out):                                  # (L, B, H)
        return tag_out.reshape(L, 2, B, n_head, 1, esph)

    dom_past = to_past(out[0, :, :B, :])
    sen_past = to_past(out[1, :, :B, :])
    gen_past = to_past(out[2, :, :B, :])

    # Keywords: equivalent to
    #   concat_i( kw_out[:,:,i,:].reshape(L,2,B,nH,1,esph), axis=-2 )
    kw_out = out[3, :, :B * K, :].reshape(L, B, K, H)
    kw_past = (kw_out.transpose(0, 2, 1, 3)                # (L, K, B, H)
               .reshape(L, K, 2, B, n_head, esph)
               .transpose(0, 2, 3, 4, 1, 5))               # (L, 2, B, nH, K, esph)

    if use_label_only:
        transfered_past = jnp.concatenate([sen_past, gen_past, kw_past],
                                          axis=-2)
        attention_mask = jnp.concatenate(
            [sentiment_mask, genre_mask, keyword_mask, mask[:, :-1]], axis=1)
    else:
        transfered_past = jnp.concatenate(
            [dom_past, sen_past, gen_past, kw_past], axis=-2)
        attention_mask = jnp.concatenate(
            [domain_mask, sentiment_mask, genre_mask, keyword_mask,
             mask[:, :-1]], axis=1)

    seq_len = input_ids.shape[-1] - 1
    position_ids = jnp.arange(seq_len, dtype=jnp.int32)[None, :]

    # TODO(synk): feed (input_ids[:, :-1], transfered_past, position_ids,
    # attention_mask) into the external GPT-2 lm_model; not reproducible here.
    past_tuple = tuple(transfered_past[l] for l in range(n_layer))
    return past_tuple, attention_mask, position_ids


# ----------------------------------------------------------------------------
# Pure-JAX reference that mirrors the kernel's bf16-in / f32-accumulate math.
# ----------------------------------------------------------------------------
def _mlp_stack_ref(x, w1, b1, w2, b2):
    # x: (T, M, E) bf16; w1: (T, L, E, H) bf16; b1/b2 f32; w2: (T, L, H, H) bf16
    h = jnp.einsum("tme,tleh->tlmh", x, w1,
                   preferred_element_type=jnp.float32) + b1
    h = jnp.maximum(h, 0.0).astype(jnp.bfloat16)
    y = jnp.einsum("tlmh,tlhg->tlmg", h, w2,
                   preferred_element_type=jnp.float32) + b2
    return y


if __name__ == "__main__":
    # Small synthetic config: n_layer=2, n_head=4, n_embd=32, vocab=50,
    # batch=2, seq(+1)=9, num_keywords=2.
    n_layer, n_head, n_embd = 2, 4, 32
    vocab, B, T1, K = 50, 2, 9, 2
    H = 2 * n_embd

    key = jax.random.PRNGKey(0)
    kp, ki, kd, ks, kg, kk = jax.random.split(key, 6)
    params = init_params(kp, vocab=vocab, n_layer=n_layer, n_embd=n_embd)

    input_ids = jax.random.randint(ki, (B, T1), 0, vocab, dtype=jnp.int32)
    domain_id = jax.random.randint(kd, (B,), 0, vocab, dtype=jnp.int32)
    sentiment_id = jax.random.randint(ks, (B,), 0, vocab, dtype=jnp.int32)
    genre_id = jax.random.randint(kg, (B,), 0, vocab, dtype=jnp.int32)
    keywords_id = jax.random.randint(kk, (B, K), 0, vocab, dtype=jnp.int32)

    domain_mask = jnp.ones((B, 1), jnp.int32)
    sentiment_mask = jnp.ones((B, 1), jnp.int32)
    genre_mask = jnp.ones((B, 1), jnp.int32)
    keyword_mask = jnp.ones((B, K), jnp.int32)
    mask = jnp.ones((B, T1), jnp.int32)

    past, attn_mask, pos_ids = sst_forward(
        params, input_ids, domain_id, keywords_id, sentiment_id, genre_id,
        domain_mask, keyword_mask, sentiment_mask, genre_mask, mask,
        n_layer=n_layer, n_head=n_head, n_embd=n_embd, use_label_only=False)
    jax.block_until_ready((past, attn_mask, pos_ids))

    # Shape checks against the torch semantics.
    esph = n_embd // n_head
    assert len(past) == n_layer
    assert past[0].shape == (2, B, n_head, 3 + K, esph), past[0].shape
    assert attn_mask.shape == (B, 3 + K + (T1 - 1)), attn_mask.shape
    assert pos_ids.shape == (1, T1 - 1), pos_ids.shape

    # Numerical check of the fused Pallas MLP stack (MLPModel forward).
    dom_emb = jnp.take(params["wte"], domain_id, axis=0)
    sen_emb = jnp.take(params["wte"], sentiment_id, axis=0)
    gen_emb = jnp.take(params["wte"], genre_id, axis=0)
    kw_flat = jnp.take(params["wte"], keywords_id, axis=0).reshape(B * K, n_embd)
    M_pad = max(8, _round_up(max(B, B * K), 8))

    def pad_rows(a):
        return jnp.pad(a, ((0, M_pad - a.shape[0]), (0, 0)))

    x_stacked = jnp.stack(
        [pad_rows(dom_emb), pad_rows(sen_emb), pad_rows(gen_emb),
         pad_rows(kw_flat)], axis=0).astype(jnp.bfloat16)

    got = fused_mlp_stack_forward(x_stacked, params["w1"], params["b1"],
                                  params["w2"], params["b2"])
    want = _mlp_stack_ref(x_stacked, params["w1"], params["b1"],
                          params["w2"], params["b2"])
    jax.block_until_ready((got, want))
    assert jnp.allclose(got, want, atol=2e-2, rtol=2e-2), (
        float(jnp.max(jnp.abs(got - want))))

    print("KERNEL_OK")
</pallas_src>

<mosaic_0001>
module attributes {stable_mosaic.version = 11 : i64} {
  func.func @_mlp_kernel(%arg0: i32, %arg1: i32, %arg2: memref<1x8x32xbf16, #tpu.memory_space<vmem>>, %arg3: memref<1x1x32x64xbf16, #tpu.memory_space<vmem>>, %arg4: memref<1x1x1x64xf32, #tpu.memory_space<vmem>>, %arg5: memref<1x1x64x64xbf16, #tpu.memory_space<vmem>>, %arg6: memref<1x1x1x64xf32, #tpu.memory_space<vmem>>, %arg7: memref<1x1x8x64xf32, #tpu.memory_space<vmem>>) attributes {dimension_semantics = [#tpu.dimension_semantics<parallel>, #tpu.dimension_semantics<parallel>], iteration_bounds = array<i64: 4, 2>, scalar_prefetch = 0 : i64, scratch_operands = 0 : i64, tpu.core_type = #tpu.core_type<tc>, window_params = [{transform_indices = @transform_0, window_bounds = array<i64: 1, 8, 32>}, {transform_indices = @transform_1, window_bounds = array<i64: 1, 1, 32, 64>}, {transform_indices = @transform_2, window_bounds = array<i64: 1, 1, 1, 64>}, {transform_indices = @transform_3, window_bounds = array<i64: 1, 1, 64, 64>}, {transform_indices = @transform_4, window_bounds = array<i64: 1, 1, 1, 64>}, {transform_indices = @transform_5, window_bounds = array<i64: 1, 1, 8, 64>}]} {
    %c0 = arith.constant 0 : index
    %c0_0 = arith.constant 0 : index
    %c0_1 = arith.constant 0 : index
    %0 = vector.load %arg2[%c0, %c0_0, %c0_1] : memref<1x8x32xbf16, #tpu.memory_space<vmem>>, vector<1x8x32xbf16>
    %1 = vector.shape_cast %0 : vector<1x8x32xbf16> to vector<8x32xbf16>
    %c0_2 = arith.constant 0 : index
    %c0_3 = arith.constant 0 : index
    %c0_4 = arith.constant 0 : index
    %c0_5 = arith.constant 0 : index
    %2 = vector.load %arg3[%c0_2, %c0_3, %c0_4, %c0_5] : memref<1x1x32x64xbf16, #tpu.memory_space<vmem>>, vector<1x1x32x64xbf16>
    %3 = vector.shape_cast %2 : vector<1x1x32x64xbf16> to vector<32x64xbf16>
    %cst = arith.constant dense<0.000000e+00> : vector<8x64xf32>
    %4 = tpu.matmul %1, %3, %cst {dimension_numbers = #tpu.dot_dimension_numbers<[1], [0], [0], [1], [0, 0, 1, 1], [], []>} : vector<8x32xbf16>, vector<32x64xbf16>, vector<8x64xf32> -> vector<8x64xf32>
    %c0_6 = arith.constant 0 : index
    %c0_7 = arith.constant 0 : index
    %c0_8 = arith.constant 0 : index
    %c0_9 = arith.constant 0 : index
    %5 = vector.load %arg4[%c0_6, %c0_7, %c0_8, %c0_9] : memref<1x1x1x64xf32, #tpu.memory_space<vmem>>, vector<1x1x1x64xf32>
    %6 = vector.shape_cast %5 : vector<1x1x1x64xf32> to vector<1x64xf32>
    %7 = vector.broadcast %6 : vector<1x64xf32> to vector<8x64xf32>
    %8 = arith.addf %4, %7 : vector<8x64xf32>
    %cst_10 = arith.constant 0.000000e+00 : f32
    %9 = vector.broadcast %cst_10 : f32 to vector<8x64xf32>
    %10 = arith.maximumf %8, %9 : vector<8x64xf32>
    %11 = arith.truncf %10 : vector<8x64xf32> to vector<8x64xbf16>
    %c0_11 = arith.constant 0 : index
    %c0_12 = arith.constant 0 : index
    %c0_13 = arith.constant 0 : index
    %c0_14 = arith.constant 0 : index
    %12 = vector.load %arg5[%c0_11, %c0_12, %c0_13, %c0_14] : memref<1x1x64x64xbf16, #tpu.memory_space<vmem>>, vector<1x1x64x64xbf16>
    %13 = vector.shape_cast %12 : vector<1x1x64x64xbf16> to vector<64x64xbf16>
    %cst_15 = arith.constant dense<0.000000e+00> : vector<8x64xf32>
    %14 = tpu.matmul %11, %13, %cst_15 {dimension_numbers = #tpu.dot_dimension_numbers<[1], [0], [0], [1], [0, 0, 1, 1], [], []>} : vector<8x64xbf16>, vector<64x64xbf16>, vector<8x64xf32> -> vector<8x64xf32>
    %c0_16 = arith.constant 0 : index
    %c0_17 = arith.constant 0 : index
    %c0_18 = arith.constant 0 : index
    %c0_19 = arith.constant 0 : index
    %15 = vector.load %arg6[%c0_16, %c0_17, %c0_18, %c0_19] : memref<1x1x1x64xf32, #tpu.memory_space<vmem>>, vector<1x1x1x64xf32>
    %16 = vector.shape_cast %15 : vector<1x1x1x64xf32> to vector<1x64xf32>
    %17 = vector.broadcast %16 : vector<1x64xf32> to vector<8x64xf32>
    %18 = arith.addf %14, %17 : vector<8x64xf32>
    %c0_20 = arith.constant 0 : index
    %c0_21 = arith.constant 0 : index
    %c0_22 = arith.constant 0 : index
    %c0_23 = arith.constant 0 : index
    %19 = vector.load %arg7[%c0_20, %c0_21, %c0_22, %c0_23] : memref<1x1x8x64xf32, #tpu.memory_space<vmem>>, vector<1x1x8x64xf32>
    %20 = vector.shape_cast %19 : vector<1x1x8x64xf32> to vector<8x64xf32>
    %21 = vector.shape_cast %18 : vector<8x64xf32> to vector<1x1x8x64xf32>
    tpu.vector_store %arg7[%c0_20, %c0_21, %c0_22, %c0_23], %21 {strides = array<i32>} : memref<1x1x8x64xf32, #tpu.memory_space<vmem>>, vector<1x1x8x64xf32>,
    return
  }
  func.func @transform_0(%arg0: i32, %arg1: i32) -> (i32, i32, i32) {
    %c0_i32 = arith.constant 0 : i32
    %c0_i32_0 = arith.constant 0 : i32
    %c0_i32_1 = arith.constant 0 : i32
    return %arg0, %c0_i32, %c0_i32_0 : i32, i32, i32
  }
  func.func @transform_1(%arg0: i32, %arg1: i32) -> (i32, i32, i32, i32) {
    %c0_i32 = arith.constant 0 : i32
    %c0_i32_0 = arith.constant 0 : i32
    %c0_i32_1 = arith.constant 0 : i32
    return %arg0, %arg1, %c0_i32, %c0_i32_0 : i32, i32, i32, i32
  }
  func.func @transform_2(%arg0: i32, %arg1: i32) -> (i32, i32, i32, i32) {
    %c0_i32 = arith.constant 0 : i32
    %c0_i32_0 = arith.constant 0 : i32
    %c0_i32_1 = arith.constant 0 : i32
    return %arg0, %arg1, %c0_i32, %c0_i32_0 : i32, i32, i32, i32
  }
  func.func @transform_3(%arg0: i32, %arg1: i32) -> (i32, i32, i32, i32) {
    %c0_i32 = arith.constant 0 : i32
    %c0_i32_0 = arith.constant 0 : i32
    %c0_i32_1 = arith.constant 0 : i32
    return %arg0, %arg1, %c0_i32, %c0_i32_0 : i32, i32, i32, i32
  }
  func.func @transform_4(%arg0: i32, %arg1: i32) -> (i32, i32, i32, i32) {
    %c0_i32 = arith.constant 0 : i32
    %c0_i32_0 = arith.constant 0 : i32
    %c0_i32_1 = arith.constant 0 : i32
    return %arg0, %arg1, %c0_i32, %c0_i32_0 : i32, i32, i32, i32
  }
  func.func @transform_5(%arg0: i32, %arg1: i32) -> (i32, i32, i32, i32) {
    %c0_i32 = arith.constant 0 : i32
    %c0_i32_0 = arith.constant 0 : i32
    %c0_i32_1 = arith.constant 0 : i32
    return %arg0, %arg1, %c0_i32, %c0_i32_0 : i32, i32, i32, i32
  }
}

</mosaic_0001>

<bundles_post_ra>
// kernel: squeeze.6
= control target key start
LH: loop header
LB: loop body
LE: loop exit
PB: predicated region body
PF: predicated region fallthrough
CT: control target
= control target key end

     0   :  { %vm11_vm0 = vcmask 64512   ;;  %s143_s10 = smov 104   ;;  %s144_s11 = smov 112   ;;  %s205_s0 = inlined_call_operand.vmem [shape: f32[1,2,2,64], index: 0, kind: input, shape index: {}]   ;;  %s206_s1 = inlined_call_operand.vmem [shape: f32[2,2,2,4,1,8], index: 1, kind: output, shape index: {}]  }
   0x1   :  { %v127_v0 = vld [vmem:[%s205_s0 + $0x2] sm:$0x3]  ;;  %v8_v1 = vld [vmem:[%s205_s0] sm:$0x3]  ;;  %s142_s0 = smov 120   ;;  %s145_s12 = smov 96  }
   0x2   :  { %7 = vst [vmem:[#allocation1 + $0x8] sm:$0x3] %v127_v0  ;;  %9 = vst [vmem:[#allocation1] sm:$0x3] %v8_v1  ;;  %s146_s13 = smov 88   ;;  %s147_s14 = smov 80  }
   0x3   :  { %s148_s15 = smov 72  }
   0x9   :  { %v18_v2 = vld.sshfl [vmem:[#allocation1] sm:$0xff pattern:$0x99999810]  }
   0xa   :  { %v10_v3 = vld [vmem:[#allocation1] sm:$0x3]   ;;  %19 = vrot.lane.b32.xlu0 %v18_v2, %s142_s0  ;;  %35 = vrot.lane.b32.xlu1 %v18_v2, %s143_s10  ;;  %v14_v4 = vld [vmem:[#allocation1 + $0x8] sm:$0x3]  }
   0xb   :  { %12 = vst.msk [vmem:[#allocation0] ss:$16 sm:$0x3] %vm11_vm0, %v10_v3   ;;  %17 = vst.msk [vmem:[#allocation0 + $0x20] ss:$16 sm:$0x3] %vm11_vm0, %v14_v4  }
   0xe   :  { %27 = vrot.lane.b32.xlu0 %v18_v2, %s144_s11  ;;  %43 = vrot.lane.b32.xlu1 %v18_v2, %s145_s12 }
  0x12   :  { %51 = vrot.lane.b32.xlu0 %v18_v2, %s146_s13  ;;  %59 = vrot.lane.b32.xlu1 %v18_v2, %s147_s14 }
  0x16   :  { %67 = vrot.lane.b32.xlu0 %v18_v2, %s148_s15 }
  0x7c   :  { %v20_v5 = vpop.permute.xlu0 %19   ;;  %v36_v6 = vpop.permute.xlu1 %35  }
  0x7d   :  { %23 = vst.msk [vmem:[#allocation0 + $0x1] ss:$16 sm:$0x3] %vm11_vm0, %v20_v5   ;;  %25 = vst.msk [vmem:[#allocation0 + $0x1] ss:$16 sm:$0xc] %vm11_vm0, %v20_v5  }
  0x7e   :  { %39 = vst.msk [vmem:[#allocation0 + $0x3] ss:$16 sm:$0x3] %vm11_vm0, %v36_v6   ;;  %41 = vst.msk [vmem:[#allocation0 + $0x3] ss:$16 sm:$0xc] %vm11_vm0, %v36_v6  }
  0x80   :  { %v28_v7 = vpop.permute.xlu0 %27   ;;  %v44_v8 = vpop.permute.xlu1 %43  }
  0x81   :  { %31 = vst.msk [vmem:[#allocation0 + $0x2] ss:$16 sm:$0x3] %vm11_vm0, %v28_v7   ;;  %33 = vst.msk [vmem:[#allocation0 + $0x2] ss:$16 sm:$0xc] %vm11_vm0, %v28_v7  }
  0x82   :  { %47 = vst.msk [vmem:[#allocation0 + $0x8] ss:$16 sm:$0x3] %vm11_vm0, %v44_v8   ;;  %49 = vst.msk [vmem:[#allocation0 + $0x8] ss:$16 sm:$0xc] %vm11_vm0, %v44_v8  }
  0x84   :  { %v52_v9 = vpop.permute.xlu0 %51   ;;  %v60_v10 = vpop.permute.xlu1 %59  }
  0x85   :  { %55 = vst.msk [vmem:[#allocation0 + $0x9] ss:$16 sm:$0x3] %vm11_vm0, %v52_v9   ;;  %57 = vst.msk [vmem:[#allocation0 + $0x9] ss:$16 sm:$0xc] %vm11_vm0, %v52_v9  }
  0x86   :  { %63 = vst.msk [vmem:[#allocation0 + $0xa] ss:$16 sm:$0x3] %vm11_vm0, %v60_v10   ;;  %65 = vst.msk [vmem:[#allocation0 + $0xa] ss:$16 sm:$0xc] %vm11_vm0, %v60_v10  }
  0x88   :  { %v77_v11 = vld [vmem:[#allocation0] sm:$0xf]  ;;  %v86_v12 = vld [vmem:[#allocation0 + $0x10] sm:$0xf]  ;;  %v68_v14 = vpop.permute.xlu0 %67  }
  0x89   :  { %v98_v13 = vld [vmem:[#allocation0 + $0x20] sm:$0xf]  ;;  %v110_v15 = vld [vmem:[#allocation0 + $0x30] sm:$0xf]  ;;  %79 = vst [vmem:[%s206_s1] sm:$0xf] %v77_v11 }
  0x8a   :  { %129 = vst [vmem:[%s206_s1 + $0x8] sm:$0xf] %v86_v12  ;;  %131 = vst [vmem:[%s206_s1 + $0x10] sm:$0xf] %v98_v13 }
  0x8b   :  { %71 = vst.msk [vmem:[#allocation0 + $0xb] ss:$16 sm:$0x3] %vm11_vm0, %v68_v14   ;;  %73 = vst.msk [vmem:[#allocation0 + $0xb] ss:$16 sm:$0xc] %vm11_vm0, %v68_v14  }
  0x8c   :  { %133 = vst [vmem:[%s206_s1 + $0x18] sm:$0xf] %v110_v15 }
  0x92   :  { %v81_v16 = vld [vmem:[#allocation0 + $0x8] sm:$0xf]  ;;  %v92_v17 = vld [vmem:[#allocation0 + $0x18] sm:$0xf] }
  0x93   :  { %v104_v18 = vld [vmem:[#allocation0 + $0x28] sm:$0xf]  ;;  %128 = vst [vmem:[%s206_s1 + $0x4] sm:$0xf] %v81_v16  ;;  %130 = vst [vmem:[%s206_s1 + $0xc] sm:$0xf] %v92_v17 }
  0x94   :  { %132 = vst [vmem:[%s206_s1 + $0x14] sm:$0xf] %v104_v18  ;;  %v116_v19 = vld [vmem:[#allocation0 + $0x38] sm:$0xf] }
  0x95   :  { %134 = vst [vmem:[%s206_s1 + $0x1c] sm:$0xf] %v116_v19 }

// kernel: sst_forward.1
= control target key start
LH: loop header
LB: loop body
LE: loop exit
PB: predicated region body
PF: predicated region fallthrough
CT: control target
= control target key end

     0   :  { %10 = vsyncpa [#allocation3], 0  ;;  %s1131_s0 = inlined_call_operand.vmem [shape: bf16[4,8,32], index: 0, kind: input, shape index: {}]   ;;  %s1132_s1 = inlined_call_operand.hbm [shape: bf16[4,2,32,64], index: 1, kind: input, shape index: {}]   ;;  %s1133_s2 = inlined_call_operand.vmem [shape: f32[4,2,1,64], index: 2, kind: input, shape index: {}]   ;;  %s1134_s3 = inlined_call_operand.vmem [shape: bf16[4,2,64,64], index: 3, kind: input, shape index: {}]   ;;  %s1135_s4 = inlined_call_operand.vmem [shape: f32[4,2,1,64], index: 4, kind: input, shape index: {}]   ;;  %s1136_s5 = inlined_call_operand.vmem [shape: f32[4,2,8,64], index: 5, kind: output, shape index: {}]  }
   0x1   :  { %12 = vsyncpa [#allocation3 + $0x1], 0  ;;  %s961_s18 = smov 0   ;;  %s963_s19 = smov 0  }
   0x2   :  { %s965_s20 = smov 0   ;;  %s967_s21 = smov 0  }
   0x3   :  { %s969_s22 = smov 0   ;;  %s971_s23 = smov 0  }
   0x4   :  { %s973_s24 = smov 0   ;;  %s975_s25 = smov 0  }
   0x5 LB: > { %s689_s26 = sadd.s32 4294967295, %s924_s25   ;;  %s27_s27 = sadd.s32 1, %s916_s23  ;;  %s924_s25 = sphi %s975_s25, %s18_s25   ;;  %s920_s24 = sphi %s973_s24, %s1153_s24   ;;  %s916_s23 = sphi %s971_s23, %s1152_s23   ;;  %s912_s22 = sphi %s969_s22, %s1151_s22   ;;  %s908_s21 = sphi %s967_s21, %s1150_s21   ;;  %s904_s20 = sphi %s965_s20, %s1149_s20   ;;  %s900_s19 = sphi %s963_s19, %s1148_s19   ;;  %s896_s18 = sphi %s961_s18, %s1147_s18  }
   0x6   : > { %p28_p0 = scmp.ge.s32.totalorder %s27_s27, 2  ;;  %s30_s28 = sadd.s32 1, %s920_s24 }
   0x7   : > { %s65_s29 = sadd.s32 1, %s904_s20  ;;  %p72_p1 = scmp.ne.s32.totalorder %s904_s20, %s900_s19 }
   0x8   : > { %s1155_s27 = smov (%p28_p0, %s27_s27), 0  ;;  %s1157_s28 = smov (!%p28_p0, %s30_s28), %s920_s24 }
   0x9   : > { %1139 = sst [smem:[#allocation5_spill]] %s1155_s27  ;;  %s61_s30 = ssub.s32 %s916_s23, %s1155_s27 }
   0xa   : > { %p73_p2 = scmp.eq.s32.totalorder %s924_s25, 0  ;;  %p32_p3 = scmp.ge.s32.totalorder %s1157_s28, 4 }
   0xb   : > { %p78_p4 = scmp.ne.s32.totalorder %s900_s19, %s896_s18  ;;  %p79_p6 = scmp.eq.s32.totalorder %s689_s26, 0 }
   0xc   : > { %p1012_p5 = por %p73_p2, %p72_p1  ;;  %s1159_s28 = smov (%p32_p3, %s1157_s28), 0 }
   0xd   : > { %1141 = sst [smem:[#allocation6_spill]] %s1159_s28  ;;  %p1018_p7 = por %p79_p6, %p78_p4 }
   0xe   : > { %s60_s8 = ssub.s32 %s920_s24, %s1159_s28  ;;  %p753_p8 = scmp.lt.s32.totalorder %s924_s25, 8 }
   0xf   : > { %s62_s9 = sor.u32 %s61_s30, %s60_s8  ;;  %s221_s10 = sand.u32 1, %s904_s20  }
  0x10   : > { %p63_p9 = scmp.eq.s32.totalorder %s62_s9, 0  ;;  %s693_s11 = sshll.u32 %s221_s10, 4 }
  0x11   : > { %s694_s12 = sshll.u32 %s916_s23, 2  ;;  %s695_s14 = sshll.u32 %s920_s24, 3 }
  0x12   : > { %s1028_s13 = scalar_select %p63_p9, %s904_s20, %s65_s29  }
  0x13   : > { %s231_s15 = sadd.s32 %s695_s14, %s694_s12  ;;  %s225_s16 = scalar_lea.vmem [#allocation2], %s693_s11 }
  0x14   : > { %s234_s17 = sshll.u32 %s225_s16, 4  ;;  %s696_s18 = sshll.u32 %s231_s15, 6  ;;  %s1031_s17 = int_to_ptr.vmem [resolvable:$true] %s234_s17 }
  0x15   : > { %s1036_s28 = scalar_lea.hbm %s1132_s1, %s696_s18  ;;  %p1042_p10 = pnand %p753_p8, %p1012_p5 }
  0x16   : > { %s1047_s30 = scalar_lea.sflag [#allocation3], %s221_s10  ;;  %s828_s8 = scalar_lea.hbm %s1036_s28, 256 }
  0x17   : > { %p829_p12 = scmp.ne.s32.totalorder %s1036_s28, %s828_s8  ;;  %p830_p13 = pneg %p1042_p10 }
  0x18   : > { %s833_s9 = scalar_lea.hbm %s1132_s1, 2048  ;;  %p834_p2 = scmp.lt.u32.totalorder %s1036_s28, %s1132_s1 }
  0x19   : > { %p831_p0 = pnand %p830_p13, %p829_p12  ;;  %p835_p3 = scmp.lt.u32.totalorder %s833_s9, %s828_s8 }
  0x1a   : > { %p837_p5 = scmp.lt.u32.totalorder %s828_s8, %s1036_s28 }
  0x1b   : > { %p832_p1 = pneg %p831_p0  ;;  %p836_p4 = por %p835_p3, %p834_p2 }
  0x1d   : > { %p838_p6 = por %p837_p5, %p836_p4 }
  0x1f   : > { %p839_p8 = pnand %p838_p6, %p832_p1 }
  0x21   : > { %842 = shalt.err (!%p839_p8)
}
  0x22   : > { %s843_s10 = scalar_lea.vmem %s1031_s17, 256  ;;  %s926_s14 = smov [#allocation2]  }
  0x23   : > { %p844_p9 = scmp.ne.s32.totalorder %s1031_s17, %s843_s10  ;;  %s848_s15 = sshll.u32 %s926_s14, 4  ;;  %s849_s15 = int_to_ptr.vmem [resolvable:$false] %s848_s15 }
  0x24   : > { %s850_s16 = scalar_lea.vmem %s849_s15, 512  ;;  %p851_p11 = scmp.lt.s32.totalorder %s1031_s17, %s849_s15 }
  0x25   : > { %p846_p12 = pnand %p844_p9, %p830_p13  ;;  %p852_p2 = scmp.lt.s32.totalorder %s850_s16, %s843_s10 }
  0x27   : > { %p847_p0 = pneg %p846_p12  ;;  %p853_p3 = por %p852_p2, %p851_p11 }
  0x29   : > { %p854_p4 = pnand %p853_p3, %p847_p0 }
  0x2b   : > { %857 = shalt.err (!%p854_p4)
}
  0x2c   : > { %s927_s18 = smov 64   ;;  %s928_s26 = smov 4  }
  0x2d   : > { %752 = dma.hbm_to_vmem [thread:$0]  (!%p1042_p10), %s1036_s28, 256, %s1031_s17, %s1047_s30, %s927_s18, %s927_s18, %s928_s26  }
  0x2e   : > { %p274_p13 = scmp.lt.s32.totalorder %s924_s25, 9  ;;  %p1144_p1 = scmp.ge.s32.totalorder %s924_s25, 1 }
  0x30   : > { %p275_p5 = pnand %p1144_p1, %p274_p13 }
  0x31   : > { %s280_s8 = sand.u32 (!%p275_p5), 1, %s900_s19  }
  0x32   : > { %278 = sbr.rel (%p275_p5) target bundleno = 501 (0x1f5), region = 40  ;;  %s698_s27 = sshll.u32 (!%p275_p5), %s280_s8, 4 }
  0x33   : > { %s281_s6 = scalar_lea.sflag (!%p275_p5), [#allocation3], %s280_s8  ;;  %s284_s9 = scalar_lea.vmem (!%p275_p5), [#allocation2], %s698_s27 }
  0x39   : > { %891 = dma.done.wait (%p1018_p7), %s281_s6, 256  }
  0x3a   : > { %893 = vsyncadd (%p1018_p7), %s281_s6, 4294967040  ;;  %p341_p10 = scmp.lt.s32.totalorder %s912_s22, 3  ;;  %p347_p11 = scmp.lt.s32.totalorder %s908_s21, 1  ;;  %v929_v0 = vmov 0.0   ;;  %vm930_vm0 = vmmov 0   ;;  %v822_v1 = vld [vmem:[%s284_s9] sm:$0xff]  }
  0x3b   : > { %727 = vmatprep.subr.bf16.mxu0 %v929_v0  ;;  %731 = vmatprep.mubr.msk.bf16.mxu0 %vm930_vm0, %v929_v0  ;;  %v823_v2 = vld [vmem:[%s284_s9 + $0x8] sm:$0xff]   ;;  %vm401_vm1 = vcmask 261120   ;;  %vm486_vm2 = vcmask 523264  }
  0x3c   : > { %s1161_s22 = smov (!%p341_p10, %s912_s22), 3  ;;  %735 = vmatprep.subr.bf16.mxu1 %v929_v0  ;;  %743 = vmatprep.mubr.msk.bf16.mxu1 %vm930_vm0, %v929_v0  ;;  %s1163_s21 = smov (!%p347_p11, %s908_s21), 1 }
  0x3d   : > { %s702_s28 = sshll.u32 %s1161_s22, 4  ;;  %s699_s17 = sshll.u32 %s1161_s22, 2  ;;  %728 = vmatpush3.bf16.msra.mxu0 %v822_v1 }
  0x3e   : > { %s701_s29 = sshll.u32 %s1163_s21, 3  ;;  %s700_s7 = sshll.u32 %s1161_s22, 1  ;;  %729 = vmatprep.subr.bf16.mxu0 %v929_v0 }
  0x3f   : > { %s358_s30 = sadd.s32 %s702_s28, %s701_s29  ;;  %s1087_s12 = sadd.s32 %s700_s7, %s1163_s21 }
  0x40   : > { %s703_s11 = sshll.u32 %s358_s30, 2  ;;  %s344_s26 = scalar_lea.vmem %s1131_s0, %s699_s17 }
  0x41   : > { %s360_s15 = scalar_lea.vmem %s1134_s3, %s703_s11  ;;  %730 = vmatpush3.bf16.msra.mxu0 %v823_v2  ;;  %v377_v5 = vld [vmem:[%s344_s26] sm:$0xf]  ;;  %s351_s8 = scalar_lea.vmem %s1133_s2, %s1087_s12 }
  0x42   : > { %v824_v3 = vld [vmem:[%s360_s15] sm:$0xff]   ;;  %v825_v4 = vld [vmem:[%s360_s15 + $0x8] sm:$0xff]   ;;  %v826_v6 = vld [vmem:[%s360_s15 + $0x10] sm:$0xff]   ;;  %s367_s9 = scalar_lea.vmem %s1135_s4, %s1087_s12  ;;  %s706_s28 = sshll.u32 %s1087_s12, 3 }
  0x43   : > { %736 = vmatpush3.bf16.msra.mxu1 %v824_v3  ;;  %v827_v7 = vld [vmem:[%s360_s15 + $0x18] sm:$0xff]   ;;  %v707_v8 = vld [vmem:[%s351_s8] ss:$0 sm:$0xff]  ;;  %s375_s30 = scalar_lea.vmem %s1136_s5, %s706_s28 }
  0x44   : > { %737 = vmatprep.subr.bf16.mxu1 %v929_v0  ;;  %732 = vmatmul.mubr.msk.bf16.vlgmr.msra.gmra.mrb[0].mxu0 %vm401_vm1, %v377_v5  ;;  %v711_v16 = vld [vmem:[%s367_s9] ss:$0 sm:$0xff] }
  0x47   : > { %738 = vmatpush3.bf16.msra.mxu1 %v825_v4 }
  0x48   : > { %739 = vmatprep.subr.bf16.mxu1 %v929_v0 }
  0x4b   : > { %740 = vmatpush3.bf16.msra.mxu1 %v826_v6 }
  0x4c   : > { %741 = vmatprep.subr.bf16.mxu1 %v929_v0 }
  0x4f   : > { %742 = vmatpush3.bf16.msra.mxu1 %v827_v7 }
 0x117   : > { %v439_v9 = vpop.f32.mrb[0].mxu0 }
 0x118   : > { %v440_v10 = vadd.f32 %v707_v8, %v439_v9  ;;  %v733_v11 = vpop.f32.mrb[1].mxu0 }
 0x119   : > { %v442_v12 = vpop.f32.mrb[2].mxu0 }
 0x11a   : > { %v445_v13 = vmax.f32 %v440_v10, 0.0  ;;  %v734_v14 = vpop.f32.mrb[3].mxu0 }
 0x11c   : > { %v446_v15 = vpack.c.bf16 %v445_v13, %v445_v13 }
 0x11e   : > { %744 = vmatmul.mubr.msk.bf16.vlgmr.msra.gmra.mrb[0].mxu1 %vm486_vm2, %v446_v15 }
 0x1f1   : > { %v524_v17 = vpop.f32.mrb[0].mxu1 }
 0x1f2   : > { %v525_v18 = vadd.f32 %v711_v16, %v524_v17  ;;  %v745_v19 = vpop.f32.mrb[1].mxu1 }
 0x1f3   : > { %v527_v20 = vpop.f32.mrb[2].mxu1 }
 0x1f4   : > { %530 = vst.msk [vmem:[%s375_s30] sm:$0xff] %vm486_vm2, %v525_v18  ;;  %v746_v21 = vpop.f32.mrb[3].mxu1 }
 0x1f5 PF: > { %s18_s25 = sadd.s32 1, %s924_s25   ;;  %s1145_s7 = sld [smem:[#allocation5_spill]] }
 0x1f6   : > { %p15_p7 = scmp.ge.s32.totalorder %s18_s25, 10   ;;  %s1146_s11 = sld [smem:[#allocation6_spill]] }
 0x1f7   : > { %s1147_s18 = smov %s900_s19  ;;  %s1148_s19 = smov %s904_s20 }
 0x1f8   : > { %s1149_s20 = smov %s1028_s13  ;;  %s1150_s21 = smov %s916_s23 }
 0x1f9   : > { %s1151_s22 = smov %s920_s24  ;;  %17 = sbr.rel (!%p15_p7) target bundleno = 5 (0x5), region = 92 }
 0x1fb   : > { %s1152_s23 = smov %s1145_s7 }
 0x1fc   : > { %s1153_s24 = smov %s1146_s11 }
 0x200   :  { %558 = vsyncpa [#allocation3], 1 }
 0x201   :  { %560 = vsyncpa [#allocation3 + $0x1], 1 }

</bundles_post_ra>
